<compile_context>
chip_gen: v7x
topology: tpu7x:2x2x1
jax: 0.10.0
libtpu: 0.0.40
codegen_flags: <defaults>
</compile_context>

<pallas_src>
import functools

import jax
import jax.numpy as jnp
from jax import lax
from jax.experimental import pallas as pl
from jax.experimental.pallas import tpu as pltpu

_GAUSS_NORM = 16.0  # [1,2,1] ⊗ [1,2,1] / 16


def _purify_kernel(x_ref, o_ref, *, plane_w: int):
    """Separable 3x3 Gaussian blur on a (TB, H*W) block of flattened planes.

    Each sublane row is one whole (H, W) plane flattened row-major, so lane j
    holds image row i = j // W, column c = j % W.  Vertical neighbours are lane
    rolls by +/-W, horizontal neighbours lane rolls by +/-1; edge masks
    implement zero padding and keep everything inside its own plane.
    """
    x = x_ref[...]
    if x.dtype != jnp.float32:
        x = x.astype(jnp.float32)
    _, L = x.shape  # L == H*W

    # Lane masks, computed once per block (O(L), amortized over TB rows).
    col = lax.broadcasted_iota(jnp.int32, (1, L), 1)
    has_up = col >= plane_w                # image row above exists
    has_dn = col < L - plane_w             # image row below exists
    incol = col % plane_w                  # column index inside the plane
    has_lf = incol > 0                     # left neighbour in same row
    has_rt = incol < plane_w - 1           # right neighbour in same row

    # Vertical [1, 2, 1] pass (zero padding at top/bottom image rows).
    up = jnp.where(has_up, pltpu.roll(x, shift=plane_w % L, axis=1), 0.0)
    dn = jnp.where(has_dn, pltpu.roll(x, shift=(L - plane_w) % L, axis=1), 0.0)
    v = 2.0 * x + up + dn

    # Horizontal [1, 2, 1] pass (zero padding at per-plane left/right edges).
    lf = jnp.where(has_lf, pltpu.roll(v, shift=1 % L, axis=1), 0.0)
    rt = jnp.where(has_rt, pltpu.roll(v, shift=(L - 1) % L, axis=1), 0.0)
    out = (2.0 * v + lf + rt) * (1.0 / _GAUSS_NORM)

    o_ref[...] = out.astype(o_ref.dtype)


def _vmem_capacity_bytes(default: int = 64 << 20) -> int:
    """Physical VMEM per core; conservative (v7x-sized) default if unknown."""
    try:
        cap = getattr(pltpu.get_tpu_info(), "vmem_capacity_bytes", None)
        if cap:
            return int(cap)
    except Exception:
        pass
    return default


def _choose_tb(nc: int, plane_bytes: int, budget_bytes: int,
               sublane: int) -> int:
    """Pick a plane-batch size TB (sublane extent of the block).

    Legal TBs: multiples of the dtype sublane tile that divide nc, or nc
    itself (full extent).  Prefer blocks within budget; among those prefer
    >= 2 grid steps (pipelining + 2 TCs on v7x), then an even step count,
    then the largest block (amortize per-step overhead).  If nothing fits the
    budget, take the smallest legal block (never a silently huge full-NC one).
    """
    legal = sorted({d for d in range(sublane, nc + 1, sublane) if nc % d == 0}
                   | {nc})
    fits = [tb for tb in legal if tb * plane_bytes <= budget_bytes]
    pool = fits if fits else [min(legal)]

    def score(tb):
        steps = nc // tb
        return (steps >= 2, steps % 2 == 0, tb)

    return max(pool, key=score)


@jax.jit
def purification(x: jax.Array) -> jax.Array:
    """Purification.forward equivalent. x: (N, C, H, W) -> same shape."""
    N, C, H, W = x.shape
    NC = N * C
    L = H * W

    # Free, contiguous layout change: one flattened plane per row.
    x2 = x.reshape(NC, L)

    itemsize = jnp.dtype(x.dtype).itemsize
    sublane = max(8, 32 // itemsize)            # 8 for f32, 16 for bf16, ...
    vmem_cap = _vmem_capacity_bytes()
    budget = max(vmem_cap // 16, 1 << 20)       # ~8 MiB on 128 MiB, ~4 MiB v7x
    plane_bytes = L * itemsize
    TB = _choose_tb(NC, plane_bytes, budget, sublane)

    block_bytes = TB * plane_bytes
    # in+out double-buffered + ~5 block-sized f32 temps in the kernel body.
    est_live = 4 * block_bytes + 5 * TB * L * 4 + (2 << 20)
    vmem_limit = int(min(vmem_cap, max((3 * vmem_cap) // 4, est_live)))

    grid = (NC // TB,)

    out = pl.pallas_call(
        functools.partial(_purify_kernel, plane_w=W),
        out_shape=jax.ShapeDtypeStruct((NC, L), x.dtype),
        grid_spec=pltpu.PrefetchScalarGridSpec(
            num_scalar_prefetch=0,
            grid=grid,
            in_specs=[pl.BlockSpec((TB, L), lambda i: (i, 0))],
            out_specs=pl.BlockSpec((TB, L), lambda i: (i, 0)),
        ),
        compiler_params=pltpu.CompilerParams(
            dimension_semantics=("parallel",),
            vmem_limit_bytes=vmem_limit,
        ),
        input_output_aliases={0: 0},
    )(x2)

    return out.reshape(N, C, H, W)


def _reference(x: jax.Array) -> jax.Array:
    """Pure-JAX reference: depthwise 3x3 Gaussian conv, zero padding."""
    N, C, H, W = x.shape
    kern = jnp.array([[1.0, 2.0, 1.0],
                      [2.0, 4.0, 2.0],
                      [1.0, 2.0, 1.0]], jnp.float32) / _GAUSS_NORM
    k = jnp.broadcast_to(kern[None, None], (C, 1, 3, 3))
    return lax.conv_general_dilated(
        x, k, window_strides=(1, 1), padding=((1, 1), (1, 1)),
        dimension_numbers=("NCHW", "OIHW", "NCHW"),
        feature_group_count=C)


if __name__ == "__main__":
    key = jax.random.PRNGKey(0)
    x = jax.random.normal(key, (2, 4, 16, 16), jnp.float32)

    y = purification(x)
    jax.block_until_ready(y)

    y_ref = _reference(x)
    assert y.shape == x.shape and y.dtype == x.dtype
    assert jnp.allclose(y, y_ref, atol=1e-5, rtol=1e-5), \
        float(jnp.max(jnp.abs(y - y_ref)))
    print("KERNEL_OK")
</pallas_src>

<mosaic_0001>
module attributes {stable_mosaic.version = 11 : i64} {
  func.func @_purify_kernel(%arg0: i32, %arg1: memref<8x256xf32, #tpu.memory_space<vmem>>, %arg2: memref<8x256xf32, #tpu.memory_space<vmem>>) attributes {dimension_semantics = [#tpu.dimension_semantics<parallel>], iteration_bounds = array<i64: 1>, scalar_prefetch = 0 : i64, scratch_operands = 0 : i64, tpu.core_type = #tpu.core_type<tc>, window_params = [{transform_indices = @transform_0, window_bounds = array<i64: 8, 256>}, {transform_indices = @transform_1, window_bounds = array<i64: 8, 256>}]} {
    %c0 = arith.constant 0 : index
    %c0_0 = arith.constant 0 : index
    %0 = vector.load %arg1[%c0, %c0_0] : memref<8x256xf32, #tpu.memory_space<vmem>>, vector<8x256xf32>
    %1 = tpu.iota {dimensions = array<i32: 1>} : vector<1x256xi32>
    %c16_i32 = arith.constant 16 : i32
    %2 = vector.broadcast %c16_i32 : i32 to vector<1x256xi32>
    %3 = arith.cmpi sge, %1, %2 : vector<1x256xi32>
    %c240_i32 = arith.constant 240 : i32
    %4 = vector.broadcast %c240_i32 : i32 to vector<1x256xi32>
    %5 = arith.cmpi slt, %1, %4 : vector<1x256xi32>
    %c16_i32_1 = arith.constant 16 : i32
    %c0_i32 = arith.constant 0 : i32
    %6 = arith.cmpi eq, %c16_i32_1, %c0_i32 : i32
    %c1_i32 = arith.constant 1 : i32
    %7 = arith.select %6, %c1_i32, %c16_i32_1 : i32
    %8 = vector.broadcast %7 : i32 to vector<1x256xi32>
    %9 = arith.remsi %1, %8 : vector<1x256xi32>
    %c0_i32_2 = arith.constant 0 : i32
    %10 = vector.broadcast %c0_i32_2 : i32 to vector<1x256xi32>
    %11 = arith.cmpi ne, %9, %10 : vector<1x256xi32>
    %c0_i32_3 = arith.constant 0 : i32
    %12 = vector.broadcast %c0_i32_3 : i32 to vector<1x256xi32>
    %13 = arith.cmpi slt, %9, %12 : vector<1x256xi32>
    %c0_i32_4 = arith.constant 0 : i32
    %14 = arith.cmpi slt, %7, %c0_i32_4 : i32
    %15 = vector.broadcast %14 : i1 to vector<1x256xi1>
    %16 = vector.broadcast %15 : vector<1x256xi1> to vector<1x256xi1>
    %17 = arith.xori %13, %16 : vector<1x256xi1>
    %18 = arith.andi %17, %11 : vector<1x256xi1>
    %19 = vector.broadcast %7 : i32 to vector<1x256xi32>
    %20 = arith.addi %9, %19 : vector<1x256xi32>
    %21 = arith.select %18, %20, %9 : vector<1x256xi1>, vector<1x256xi32>
    %c0_i32_5 = arith.constant 0 : i32
    %22 = vector.broadcast %c0_i32_5 : i32 to vector<1x256xi32>
    %23 = arith.cmpi sgt, %21, %22 : vector<1x256xi32>
    %c15_i32 = arith.constant 15 : i32
    %24 = vector.broadcast %c15_i32 : i32 to vector<1x256xi32>
    %25 = arith.cmpi slt, %21, %24 : vector<1x256xi32>
    %c16_i32_6 = arith.constant 16 : i32
    %26 = tpu.dynamic_rotate %0 by %c16_i32_6 dim 1 : vector<8x256xf32>, i32 -> vector<8x256xf32>
    %cst = arith.constant 0.000000e+00 : f32
    %27 = vector.shape_cast %3 : vector<1x256xi1> to vector<1x256xi1>
    %28 = vector.broadcast %27 : vector<1x256xi1> to vector<8x256xi1>
    %29 = vector.broadcast %cst : f32 to vector<8x256xf32>
    %30 = arith.select %28, %26, %29 : vector<8x256xi1>, vector<8x256xf32>
    %c240_i32_7 = arith.constant 240 : i32
    %31 = tpu.dynamic_rotate %0 by %c240_i32_7 dim 1 : vector<8x256xf32>, i32 -> vector<8x256xf32>
    %cst_8 = arith.constant 0.000000e+00 : f32
    %32 = vector.shape_cast %5 : vector<1x256xi1> to vector<1x256xi1>
    %33 = vector.broadcast %32 : vector<1x256xi1> to vector<8x256xi1>
    %34 = vector.broadcast %cst_8 : f32 to vector<8x256xf32>
    %35 = arith.select %33, %31, %34 : vector<8x256xi1>, vector<8x256xf32>
    %cst_9 = arith.constant 2.000000e+00 : f32
    %36 = vector.broadcast %cst_9 : f32 to vector<8x256xf32>
    %37 = arith.mulf %36, %0 : vector<8x256xf32>
    %38 = arith.addf %37, %30 : vector<8x256xf32>
    %39 = arith.addf %38, %35 : vector<8x256xf32>
    %c1_i32_10 = arith.constant 1 : i32
    %40 = tpu.dynamic_rotate %39 by %c1_i32_10 dim 1 : vector<8x256xf32>, i32 -> vector<8x256xf32>
    %cst_11 = arith.constant 0.000000e+00 : f32
    %41 = vector.shape_cast %23 : vector<1x256xi1> to vector<1x256xi1>
    %42 = vector.broadcast %41 : vector<1x256xi1> to vector<8x256xi1>
    %43 = vector.broadcast %cst_11 : f32 to vector<8x256xf32>
    %44 = arith.select %42, %40, %43 : vector<8x256xi1>, vector<8x256xf32>
    %c255_i32 = arith.constant 255 : i32
    %45 = tpu.dynamic_rotate %39 by %c255_i32 dim 1 : vector<8x256xf32>, i32 -> vector<8x256xf32>
    %cst_12 = arith.constant 0.000000e+00 : f32
    %46 = vector.shape_cast %25 : vector<1x256xi1> to vector<1x256xi1>
    %47 = vector.broadcast %46 : vector<1x256xi1> to vector<8x256xi1>
    %48 = vector.broadcast %cst_12 : f32 to vector<8x256xf32>
    %49 = arith.select %47, %45, %48 : vector<8x256xi1>, vector<8x256xf32>
    %cst_13 = arith.constant 2.000000e+00 : f32
    %50 = vector.broadcast %cst_13 : f32 to vector<8x256xf32>
    %51 = arith.mulf %50, %39 : vector<8x256xf32>
    %52 = arith.addf %51, %44 : vector<8x256xf32>
    %53 = arith.addf %52, %49 : vector<8x256xf32>
    %cst_14 = arith.constant 6.250000e-02 : f32
    %54 = vector.broadcast %cst_14 : f32 to vector<8x256xf32>
    %55 = arith.mulf %53, %54 : vector<8x256xf32>
    %c0_15 = arith.constant 0 : index
    %c0_16 = arith.constant 0 : index
    %56 = vector.load %arg2[%c0_15, %c0_16] : memref<8x256xf32, #tpu.memory_space<vmem>>, vector<8x256xf32>
    tpu.vector_store %arg2[%c0_15, %c0_16], %55 {strides = array<i32>} : memref<8x256xf32, #tpu.memory_space<vmem>>, vector<8x256xf32>,
    return
  }
  func.func @transform_0(%arg0: i32) -> (i32, i32) {
    %c0_i32 = arith.constant 0 : i32
    %c0_i32_0 = arith.constant 0 : i32
    return %arg0, %c0_i32 : i32, i32
  }
  func.func @transform_1(%arg0: i32) -> (i32, i32) {
    %c0_i32 = arith.constant 0 : i32
    %c0_i32_0 = arith.constant 0 : i32
    return %arg0, %c0_i32 : i32, i32
  }
}

</mosaic_0001>

<bundles_post_ra>
// kernel: purification.1
= control target key start
LH: loop header
LB: loop body
LE: loop exit
PB: predicated region body
PF: predicated region fallthrough
CT: control target
= control target key end

     0   :  { %s121_s8 = smov 112   ;;  %s122_s9 = smov 16   ;;  %v10_v2 = vlaneseq  ;;  %s147_s0 = inlined_call_operand.vmem [shape: f32[8,256], index: 0, kind: input, shape index: {}, may-alias: {0,1}]   ;;  %s148_s1 = inlined_call_operand.vmem [shape: f32[8,256], index: 1, kind: output, shape index: {}, may-alias: {0,1}]  }
   0x1   :  { %v8_v0 = vld [vmem:[%s147_s0] sm:$0xff]  ;;  %v9_v1 = vld [vmem:[%s147_s0 + $0x8] sm:$0xff]  ;;  %s123_s0 = smov 1   ;;  %s124_s12 = smov 127  }
   0x2   :  { %58 = vrot.lane.b32.xlu1 %v8_v0, %s121_s8  ;;  %45 = vrot.lane.b32.xlu0 %v8_v0, %s122_s9  ;;  %v11_v3 = vand.u32 127, %v10_v2  ;;  %v72_v7 = vmul.f32 2.0, %v9_v1  ;;  %v71_v8 = vmul.f32 2.0, %v8_v0 }
   0x4   :  { %v12_v4 = vadd.s32 128, %v11_v3  ;;  %vm62_vm0 = vcmp.lt.s32.totalorder %v11_v3, 112  ;;  %vm49_vm1 = vcmp.lt.s32.totalorder %v11_v3, 16  ;;  %vm13_vm3 = vcmp.ge.s32.totalorder %v11_v3, 16 }
   0x5   :  { %v21_v21 = vand.u32 15, %v11_v3  ;;  %vm81_vm4 = vcmp.lt.s32.totalorder %v11_v3, 1  ;;  %vm94_vm7 = vcmp.lt.s32.totalorder %v11_v3, 127 }
   0x6   :  { %60 = vrot.lane.b32.xlu1 %v9_v1, %s121_s8  ;;  %47 = vrot.lane.b32.xlu0 %v9_v1, %s122_s9  ;;  %vm16_vm2 = vcmp.lt.s32.totalorder %v12_v4, 240  ;;  %v28_v22 = vand.u32 15, %v12_v4 }
   0x7   :  { %vm41_vm5 = vcmp.gt.s32.totalorder %v21_v21, 0  ;;  %vm43_vm8 = vcmp.lt.s32.totalorder %v21_v21, 15 }
   0x8   :  { %vm42_vm6 = vcmp.gt.s32.totalorder %v28_v22, 0  ;;  %vm44_vm9 = vcmp.lt.s32.totalorder %v28_v22, 15 }
  0x74   :  { %v59_v5 = vpop.permute.xlu1 %58  ;;  %v46_v6 = vpop.permute.xlu0 %45 }
  0x78   :  { %v61_v9 = vpop.permute.xlu1 %60  ;;  %v48_v10 = vpop.permute.xlu0 %47 }
  0x79   :  { %v64_v11 = vsel %vm62_vm0, %v61_v9, %v59_v5  ;;  %v50_v12 = vsel %vm49_vm1, %v46_v6, %v48_v10  ;;  %v51_v13 = vsel %vm49_vm1, %v48_v10, %v46_v6  ;;  %v63_v18 = vsel %vm62_vm0, %v59_v5, %v61_v9 }
  0x7a   :  { %v70_v14 = vsel %vm16_vm2, %v64_v11, 0.0  ;;  %v56_v15 = vsel %vm13_vm3, %v51_v13, 0.0  ;;  %v74_v16 = vadd.f32 %v72_v7, %v50_v12 }
  0x7b   :  { %v73_v17 = vadd.f32 %v71_v8, %v56_v15 }
  0x7c   :  { %v76_v19 = vadd.f32 %v74_v16, %v70_v14 }
  0x7d   :  { %v75_v20 = vadd.f32 %v73_v17, %v63_v18 }
  0x7e   :  { %79 = vrot.lane.b32.xlu1 %v76_v19, %s123_s0  ;;  %v104_v29 = vmul.f32 2.0, %v76_v19 }
  0x7f   :  { %77 = vrot.lane.b32.xlu0 %v75_v20, %s123_s0  ;;  %v103_v30 = vmul.f32 2.0, %v75_v20 }
  0x82   :  { %92 = vrot.lane.b32.xlu1 %v76_v19, %s124_s12 }
  0x83   :  { %90 = vrot.lane.b32.xlu0 %v75_v20, %s124_s12 }
  0xf0   :  { %v80_v23 = vpop.permute.xlu1 %79 }
  0xf1   :  { %v78_v24 = vpop.permute.xlu0 %77 }
  0xf2   :  { %v82_v25 = vsel %vm81_vm4, %v78_v24, %v80_v23  ;;  %v83_v26 = vsel %vm81_vm4, %v80_v23, %v78_v24 }
  0xf3   :  { %v88_v27 = vsel %vm41_vm5, %v83_v26, 0.0  ;;  %v89_v28 = vsel %vm42_vm6, %v82_v25, 0.0 }
  0xf4   :  { %v93_v31 = vpop.permute.xlu1 %92  ;;  %v105_v33 = vadd.f32 %v103_v30, %v88_v27  ;;  %v106_v34 = vadd.f32 %v104_v29, %v89_v28 }
  0xf5   :  { %v91_v32 = vpop.permute.xlu0 %90 }
  0xf6   :  { %v95_v35 = vsel %vm94_vm7, %v91_v32, %v93_v31  ;;  %v96_v36 = vsel %vm94_vm7, %v93_v31, %v91_v32 }
  0xf7   :  { %v101_v37 = vsel %vm43_vm8, %v95_v35, 0.0  ;;  %v102_v38 = vsel %vm44_vm9, %v96_v36, 0.0 }
  0xf8   :  { %v107_v39 = vadd.f32 %v105_v33, %v101_v37  ;;  %v108_v40 = vadd.f32 %v106_v34, %v102_v38 }
  0xfa   :  { %v109_v41 = vmul.f32 0.0625, %v107_v39  ;;  %v110_v42 = vmul.f32 0.0625, %v108_v40 }
  0xfc   :  { %111 = vst [vmem:[%s148_s1] sm:$0xff] %v109_v41  ;;  %112 = vst [vmem:[%s148_s1 + $0x8] sm:$0xff] %v110_v42 }

</bundles_post_ra>
